<compile_context>
chip_gen: v5e
topology: v5e:2x2
jax: 0.10.0
libtpu: 0.0.40
codegen_flags: <defaults>
</compile_context>

<pallas_src>
import functools

import jax
import jax.numpy as jnp
import numpy as np
from jax.experimental import pallas as pl
from jax.experimental.pallas import tpu as pltpu


def _se_kernel(x_ref, w1_ref, b1_ref, w2_ref, b2_ref, o_ref, *,
               hw, channels_last, use_mxu):
    x = x_ref[...]                                   # (Nb, C, HW) or (Nb, HW, C)

    # ---- squeeze: global average pool (accumulate in f32) ----
    xf = x.astype(jnp.float32)
    pool_axis = 1 if channels_last else 2
    pooled = jnp.sum(xf, axis=pool_axis) * jnp.float32(1.0 / hw)   # (Nb, C)

    # ---- excitation MLP ----
    if use_mxu:
        # Production channel counts: run the two 1x1 convs on the MXU.
        # w1_ref: (C, r), w2_ref: (r, C) (pre-transposed in the wrapper).
        h = jnp.dot(pooled, w1_ref[...],
                    preferred_element_type=jnp.float32) + b1_ref[...]
        h = h * jax.nn.sigmoid(h)                                  # SiLU, (Nb, r)
        g = jnp.dot(h, w2_ref[...],
                    preferred_element_type=jnp.float32) + b2_ref[...]
    else:
        # Tiny channel counts: VPU broadcast-multiply + reduce, keeps MXU
        # pipeline latency off the pooled->gate critical path.
        # w1_ref: (r, C), w2_ref: (C, r).
        h = jnp.sum(pooled[:, None, :] * w1_ref[...][None, :, :], axis=-1) \
            + b1_ref[...]
        h = h * jax.nn.sigmoid(h)                                  # SiLU, (Nb, r)
        g = jnp.sum(h[:, None, :] * w2_ref[...][None, :, :], axis=-1) \
            + b2_ref[...]
    g = jax.nn.sigmoid(g)                                          # (Nb, C) f32

    # ---- scale: channel-wise gate, lane-dense full-vreg stores ----
    gx = g.astype(x.dtype)
    if channels_last:
        o_ref[...] = x * gx[:, None, :]
    else:
        o_ref[...] = x * gx[:, :, None]


def _pick_block_n(n, per_image_bytes, tile_budget_bytes, min_steps=8):
    """Images per grid step: fit 2x-in + 2x-out buffers in the VMEM budget while
    keeping >= min_steps grid steps (pipelining + megacore) when the batch allows."""
    max_by_vmem = max(1, int(tile_budget_bytes // (4 * per_image_bytes)))
    target = max(1, min(max_by_vmem, pl.cdiv(n, min_steps)))
    nb = min(target, n)
    while n % nb:                       # round down to a divisor of N
        nb -= 1
    return nb


def squeeze_excitation(x_nchw, w1, b1, w2, b2, *, block_n=None):
    """x_nchw: (N, C, H, W) (PyTorch layout), f32 or bf16. Returns (N, C, H, W)."""
    N, C, H, W = x_nchw.shape
    r = w1.shape[0]
    HW = H * W
    itemsize = jnp.dtype(x_nchw.dtype).itemsize

    # ---- per-generation VMEM budget --------------------------------------
    try:
        vmem_cap = int(pltpu.get_tpu_info().vmem_capacity_bytes)
    except Exception:
        vmem_cap = 64 << 20             # conservative: v7x per-TensorCore VMEM
    tile_budget = vmem_cap // 2         # headroom for weights / f32 temporaries
    vmem_limit = int(vmem_cap * 3 // 4)

    per_image_bytes = C * HW * itemsize
    if block_n is None:
        block_n = _pick_block_n(N, per_image_bytes, tile_budget)
    else:
        block_n = max(1, min(block_n, N))
        while N % block_n:
            block_n -= 1
    Nb = block_n
    grid = (N // Nb,)

    # ---- lane-dense working layout ----------------------------------------
    channels_last = (HW % 128 != 0)
    if channels_last:
        # H*W (e.g. 49/196/784) would under-fill the 128 lanes -> put C on lanes.
        # (Layout plumbing done by XLA outside the kernel.)
        x3 = jnp.transpose(x_nchw.reshape(N, C, HW), (0, 2, 1))    # (N, HW, C)
        blk = (Nb, HW, C)
    else:
        x3 = x_nchw.reshape(N, C, HW)                              # (N, C, HW)
        blk = (Nb, C, HW)
    # NOTE: at real EfficientNet SE shapes the second-to-last block dim (C or HW)
    # is >= 8 (bf16: >= 16), so sublanes are dense; only the toy C=4 test wastes them.

    # ---- excitation MLP operand layout ------------------------------------
    use_mxu = (C >= 64)
    if use_mxu:
        w1_k, w2_k = w1.T, w2.T          # (C, r), (r, C) for jnp.dot on the MXU
    else:
        w1_k, w2_k = w1, w2              # (r, C), (C, r) for the VPU path
    w1_k = w1_k.astype(jnp.float32)
    w2_k = w2_k.astype(jnp.float32)
    b1_2d = b1.reshape(1, r).astype(jnp.float32)
    b2_2d = b2.reshape(1, C).astype(jnp.float32)

    kern = functools.partial(_se_kernel, hw=HW,
                             channels_last=channels_last, use_mxu=use_mxu)
    const = lambda n: (0, 0)             # weights/biases resident across the grid

    cost = pl.CostEstimate(
        flops=int(3 * N * C * HW + 4 * N * C * r),
        transcendentals=int(2 * N * (C + r)),
        bytes_accessed=int(2 * N * C * HW * itemsize
                           + 4 * (w1.size + w2.size + b1.size + b2.size)),
    )

    def build(weight_kwargs):
        return pl.pallas_call(
            kern,
            out_shape=jax.ShapeDtypeStruct(x3.shape, x3.dtype),
            grid_spec=pltpu.PrefetchScalarGridSpec(
                num_scalar_prefetch=0,
                grid=grid,
                in_specs=[
                    pl.BlockSpec(blk, lambda n: (n, 0, 0)),          # x block
                    pl.BlockSpec(w1_k.shape, const, **weight_kwargs),  # conv1 w
                    pl.BlockSpec((1, r), const, **weight_kwargs),      # conv1 b
                    pl.BlockSpec(w2_k.shape, const, **weight_kwargs),  # conv2 w
                    pl.BlockSpec((1, C), const, **weight_kwargs),      # conv2 b
                ],
                out_specs=pl.BlockSpec(blk, lambda n: (n, 0, 0)),
            ),
            compiler_params=pltpu.CompilerParams(
                dimension_semantics=("parallel",),
                vmem_limit_bytes=vmem_limit),
            cost_estimate=cost,
        )

    try:
        # Grid-invariant weights/biases: single-buffer them (no useless 2nd copy).
        out = build(dict(pipeline_mode=pl.Buffered(1)))(x3, w1_k, b1_2d, w2_k, b2_2d)
    except Exception:
        # Older JAX without pipeline_mode on BlockSpec: default double buffering.
        out = build({})(x3, w1_k, b1_2d, w2_k, b2_2d)

    if channels_last:
        out = jnp.transpose(out, (0, 2, 1))
    return out.reshape(N, C, H, W)


def ref_forward(x, w1, b1, w2, b2):
    """Pure-JAX reference with identical math."""
    pooled = x.astype(jnp.float32).mean(axis=(2, 3))    # (N, C)
    h = pooled @ w1.T + b1                              # (N, r)
    h = h * jax.nn.sigmoid(h)                           # SiLU
    g = jax.nn.sigmoid(h @ w2.T + b2)                   # (N, C)
    return x * g[:, :, None, None].astype(x.dtype)


if __name__ == "__main__":
    # SqueezeExcitation(c_in=4, reduction=4) on a (2, 4, 16, 16) input.
    N, C, H, W = 2, 4, 16, 16
    R = 4                                               # hidden (reduction) channels

    key = jax.random.PRNGKey(0)
    kx, k1, k2, k3, k4 = jax.random.split(key, 5)
    x = jax.random.normal(kx, (N, C, H, W), jnp.float32)        # NCHW, PyTorch layout
    # nn.Conv2d weights (out, in, 1, 1) squeezed to (out, in); biases present.
    w1 = 0.3 * jax.random.normal(k1, (R, C), jnp.float32)
    b1 = 0.1 * jax.random.normal(k2, (R,), jnp.float32)
    w2 = 0.3 * jax.random.normal(k3, (C, R), jnp.float32)
    b2 = 0.1 * jax.random.normal(k4, (C,), jnp.float32)

    out = squeeze_excitation(x, w1, b1, w2, b2)
    out = jax.block_until_ready(out)

    ref = ref_forward(x, w1, b1, w2, b2)
    np.testing.assert_allclose(np.asarray(out), np.asarray(ref),
                               rtol=1e-5, atol=1e-5)
    assert out.shape == (N, C, H, W)
    print("KERNEL_OK")
</pallas_src>

<mosaic_0001>
module attributes {stable_mosaic.version = 11 : i64} {
  func.func @_se_kernel(%arg0: i32, %arg1: memref<1x4x256xf32, #tpu.memory_space<vmem>>, %arg2: memref<4x4xf32, #tpu.memory_space<vmem>>, %arg3: memref<1x4xf32, #tpu.memory_space<vmem>>, %arg4: memref<4x4xf32, #tpu.memory_space<vmem>>, %arg5: memref<1x4xf32, #tpu.memory_space<vmem>>, %arg6: memref<1x4x256xf32, #tpu.memory_space<vmem>>) attributes {dimension_semantics = [#tpu.dimension_semantics<parallel>], iteration_bounds = array<i64: 2>, scalar_prefetch = 0 : i64, scratch_operands = 0 : i64, tpu.core_type = #tpu.core_type<tc>, window_params = [{transform_indices = @transform_0, window_bounds = array<i64: 1, 4, 256>}, {pipeline_mode = #tpu.pipeline_mode<synchronous>, transform_indices = @transform_1, window_bounds = array<i64: 4, 4>}, {pipeline_mode = #tpu.pipeline_mode<synchronous>, transform_indices = @transform_2, window_bounds = array<i64: 1, 4>}, {pipeline_mode = #tpu.pipeline_mode<synchronous>, transform_indices = @transform_3, window_bounds = array<i64: 4, 4>}, {pipeline_mode = #tpu.pipeline_mode<synchronous>, transform_indices = @transform_4, window_bounds = array<i64: 1, 4>}, {transform_indices = @transform_5, window_bounds = array<i64: 1, 4, 256>}]} {
    %c0 = arith.constant 0 : index
    %c0_0 = arith.constant 0 : index
    %c0_1 = arith.constant 0 : index
    %0 = vector.load %arg1[%c0, %c0_0, %c0_1] : memref<1x4x256xf32, #tpu.memory_space<vmem>>, vector<1x4x256xf32>
    %cst = arith.constant dense<0.000000e+00> : vector<1x4xf32>
    %1 = vector.multi_reduction <add>, %0, %cst [2] : vector<1x4x256xf32> to vector<1x4xf32>
    %cst_2 = arith.constant 3.906250e-03 : f32
    %2 = vector.broadcast %cst_2 : f32 to vector<1x4xf32>
    %3 = arith.mulf %1, %2 : vector<1x4xf32>
    %4 = vector.shape_cast %3 : vector<1x4xf32> to vector<1x1x4xf32>
    %c0_3 = arith.constant 0 : index
    %c0_4 = arith.constant 0 : index
    %5 = vector.load %arg2[%c0_3, %c0_4] : memref<4x4xf32, #tpu.memory_space<vmem>>, vector<4x4xf32>
    %6 = vector.shape_cast %5 : vector<4x4xf32> to vector<1x4x4xf32>
    %7 = vector.broadcast %4 : vector<1x1x4xf32> to vector<1x4x4xf32>
    %8 = arith.mulf %7, %6 : vector<1x4x4xf32>
    %cst_5 = arith.constant dense<0.000000e+00> : vector<1x4xf32>
    %9 = vector.multi_reduction <add>, %8, %cst_5 [2] : vector<1x4x4xf32> to vector<1x4xf32>
    %c0_6 = arith.constant 0 : index
    %c0_7 = arith.constant 0 : index
    %10 = vector.load %arg3[%c0_6, %c0_7] : memref<1x4xf32, #tpu.memory_space<vmem>>, vector<1x4xf32>
    %11 = arith.addf %9, %10 : vector<1x4xf32>
    %12 = arith.negf %11 : vector<1x4xf32>
    %13 = math.exp %12 : vector<1x4xf32>
    %cst_8 = arith.constant 1.000000e+00 : f32
    %14 = vector.broadcast %cst_8 : f32 to vector<1x4xf32>
    %15 = arith.addf %14, %13 : vector<1x4xf32>
    %16 = arith.divf %14, %15 : vector<1x4xf32>
    %17 = arith.mulf %11, %16 : vector<1x4xf32>
    %18 = vector.shape_cast %17 : vector<1x4xf32> to vector<1x1x4xf32>
    %c0_9 = arith.constant 0 : index
    %c0_10 = arith.constant 0 : index
    %19 = vector.load %arg4[%c0_9, %c0_10] : memref<4x4xf32, #tpu.memory_space<vmem>>, vector<4x4xf32>
    %20 = vector.shape_cast %19 : vector<4x4xf32> to vector<1x4x4xf32>
    %21 = vector.broadcast %18 : vector<1x1x4xf32> to vector<1x4x4xf32>
    %22 = arith.mulf %21, %20 : vector<1x4x4xf32>
    %cst_11 = arith.constant dense<0.000000e+00> : vector<1x4xf32>
    %23 = vector.multi_reduction <add>, %22, %cst_11 [2] : vector<1x4x4xf32> to vector<1x4xf32>
    %c0_12 = arith.constant 0 : index
    %c0_13 = arith.constant 0 : index
    %24 = vector.load %arg5[%c0_12, %c0_13] : memref<1x4xf32, #tpu.memory_space<vmem>>, vector<1x4xf32>
    %25 = arith.addf %23, %24 : vector<1x4xf32>
    %26 = arith.negf %25 : vector<1x4xf32>
    %27 = math.exp %26 : vector<1x4xf32>
    %cst_14 = arith.constant 1.000000e+00 : f32
    %28 = vector.broadcast %cst_14 : f32 to vector<1x4xf32>
    %29 = arith.addf %28, %27 : vector<1x4xf32>
    %30 = arith.divf %28, %29 : vector<1x4xf32>
    %31 = vector.shape_cast %30 : vector<1x4xf32> to vector<1x4x1xf32>
    %32 = vector.broadcast %31 : vector<1x4x1xf32> to vector<1x4x256xf32>
    %33 = arith.mulf %0, %32 : vector<1x4x256xf32>
    %c0_15 = arith.constant 0 : index
    %c0_16 = arith.constant 0 : index
    %c0_17 = arith.constant 0 : index
    %34 = vector.load %arg6[%c0_15, %c0_16, %c0_17] : memref<1x4x256xf32, #tpu.memory_space<vmem>>, vector<1x4x256xf32>
    tpu.vector_store %arg6[%c0_15, %c0_16, %c0_17], %33 {strides = array<i32>} : memref<1x4x256xf32, #tpu.memory_space<vmem>>, vector<1x4x256xf32>,
    return
  }
  func.func @transform_0(%arg0: i32) -> (i32, i32, i32) {
    %c0_i32 = arith.constant 0 : i32
    %c0_i32_0 = arith.constant 0 : i32
    %c0_i32_1 = arith.constant 0 : i32
    return %arg0, %c0_i32, %c0_i32_0 : i32, i32, i32
  }
  func.func @transform_1(%arg0: i32) -> (i32, i32) {
    %c0_i32 = arith.constant 0 : i32
    %c0_i32_0 = arith.constant 0 : i32
    %c0_i32_1 = arith.constant 0 : i32
    return %c0_i32, %c0_i32_0 : i32, i32
  }
  func.func @transform_2(%arg0: i32) -> (i32, i32) {
    %c0_i32 = arith.constant 0 : i32
    %c0_i32_0 = arith.constant 0 : i32
    %c0_i32_1 = arith.constant 0 : i32
    return %c0_i32, %c0_i32_0 : i32, i32
  }
  func.func @transform_3(%arg0: i32) -> (i32, i32) {
    %c0_i32 = arith.constant 0 : i32
    %c0_i32_0 = arith.constant 0 : i32
    %c0_i32_1 = arith.constant 0 : i32
    return %c0_i32, %c0_i32_0 : i32, i32
  }
  func.func @transform_4(%arg0: i32) -> (i32, i32) {
    %c0_i32 = arith.constant 0 : i32
    %c0_i32_0 = arith.constant 0 : i32
    %c0_i32_1 = arith.constant 0 : i32
    return %c0_i32, %c0_i32_0 : i32, i32
  }
  func.func @transform_5(%arg0: i32) -> (i32, i32, i32) {
    %c0_i32 = arith.constant 0 : i32
    %c0_i32_0 = arith.constant 0 : i32
    %c0_i32_1 = arith.constant 0 : i32
    return %arg0, %c0_i32, %c0_i32_0 : i32, i32, i32
  }
}

module attributes {stable_mosaic.version = 11 : i64} {
  func.func @_se_kernel(%arg0: i32, %arg1: memref<1x4x256xf32, #tpu.memory_space<vmem>>, %arg2: memref<4x4xf32, #tpu.memory_space<vmem>>, %arg3: memref<1x4xf32, #tpu.memory_space<vmem>>, %arg4: memref<4x4xf32, #tpu.memory_space<vmem>>, %arg5: memref<1x4xf32, #tpu.memory_space<vmem>>, %arg6: memref<1x4x256xf32, #tpu.memory_space<vmem>>) attributes {dimension_semantics = [#tpu.dimension_semantics<parallel>], iteration_bounds = array<i64: 2>, scalar_prefetch = 0 : i64, scratch_operands = 0 : i64, tpu.core_type = #tpu.core_type<tc>, window_params = [{transform_indices = @transform_0, window_bounds = array<i64: 1, 4, 256>}, {pipeline_mode = #tpu.pipeline_mode<synchronous>, transform_indices = @transform_1, window_bounds = array<i64: 4, 4>}, {pipeline_mode = #tpu.pipeline_mode<synchronous>, transform_indices = @transform_2, window_bounds = array<i64: 1, 4>}, {pipeline_mode = #tpu.pipeline_mode<synchronous>, transform_indices = @transform_3, window_bounds = array<i64: 4, 4>}, {pipeline_mode = #tpu.pipeline_mode<synchronous>, transform_indices = @transform_4, window_bounds = array<i64: 1, 4>}, {transform_indices = @transform_5, window_bounds = array<i64: 1, 4, 256>}]} {
    %c0 = arith.constant 0 : index
    %c0_0 = arith.constant 0 : index
    %c0_1 = arith.constant 0 : index
    %0 = vector.load %arg1[%c0, %c0_0, %c0_1] : memref<1x4x256xf32, #tpu.memory_space<vmem>>, vector<1x4x256xf32>
    %cst = arith.constant dense<0.000000e+00> : vector<1x4xf32>
    %1 = vector.multi_reduction <add>, %0, %cst [2] : vector<1x4x256xf32> to vector<1x4xf32>
    %cst_2 = arith.constant 3.906250e-03 : f32
    %2 = vector.broadcast %cst_2 : f32 to vector<1x4xf32>
    %3 = arith.mulf %1, %2 : vector<1x4xf32>
    %4 = vector.shape_cast %3 : vector<1x4xf32> to vector<1x1x4xf32>
    %c0_3 = arith.constant 0 : index
    %c0_4 = arith.constant 0 : index
    %5 = vector.load %arg2[%c0_3, %c0_4] : memref<4x4xf32, #tpu.memory_space<vmem>>, vector<4x4xf32>
    %6 = vector.shape_cast %5 : vector<4x4xf32> to vector<1x4x4xf32>
    %7 = vector.broadcast %4 : vector<1x1x4xf32> to vector<1x4x4xf32>
    %8 = arith.mulf %7, %6 : vector<1x4x4xf32>
    %cst_5 = arith.constant dense<0.000000e+00> : vector<1x4xf32>
    %9 = vector.multi_reduction <add>, %8, %cst_5 [2] : vector<1x4x4xf32> to vector<1x4xf32>
    %c0_6 = arith.constant 0 : index
    %c0_7 = arith.constant 0 : index
    %10 = vector.load %arg3[%c0_6, %c0_7] : memref<1x4xf32, #tpu.memory_space<vmem>>, vector<1x4xf32>
    %11 = arith.addf %9, %10 : vector<1x4xf32>
    %12 = arith.negf %11 : vector<1x4xf32>
    %13 = math.exp %12 : vector<1x4xf32>
    %cst_8 = arith.constant 1.000000e+00 : f32
    %14 = vector.broadcast %cst_8 : f32 to vector<1x4xf32>
    %15 = arith.addf %14, %13 : vector<1x4xf32>
    %16 = arith.divf %14, %15 : vector<1x4xf32>
    %17 = arith.mulf %11, %16 : vector<1x4xf32>
    %18 = vector.shape_cast %17 : vector<1x4xf32> to vector<1x1x4xf32>
    %c0_9 = arith.constant 0 : index
    %c0_10 = arith.constant 0 : index
    %19 = vector.load %arg4[%c0_9, %c0_10] : memref<4x4xf32, #tpu.memory_space<vmem>>, vector<4x4xf32>
    %20 = vector.shape_cast %19 : vector<4x4xf32> to vector<1x4x4xf32>
    %21 = vector.broadcast %18 : vector<1x1x4xf32> to vector<1x4x4xf32>
    %22 = arith.mulf %21, %20 : vector<1x4x4xf32>
    %cst_11 = arith.constant dense<0.000000e+00> : vector<1x4xf32>
    %23 = vector.multi_reduction <add>, %22, %cst_11 [2] : vector<1x4x4xf32> to vector<1x4xf32>
    %c0_12 = arith.constant 0 : index
    %c0_13 = arith.constant 0 : index
    %24 = vector.load %arg5[%c0_12, %c0_13] : memref<1x4xf32, #tpu.memory_space<vmem>>, vector<1x4xf32>
    %25 = arith.addf %23, %24 : vector<1x4xf32>
    %26 = arith.negf %25 : vector<1x4xf32>
    %27 = math.exp %26 : vector<1x4xf32>
    %cst_14 = arith.constant 1.000000e+00 : f32
    %28 = vector.broadcast %cst_14 : f32 to vector<1x4xf32>
    %29 = arith.addf %28, %27 : vector<1x4xf32>
    %30 = arith.divf %28, %29 : vector<1x4xf32>
    %31 = vector.shape_cast %30 : vector<1x4xf32> to vector<1x4x1xf32>
    %32 = vector.broadcast %31 : vector<1x4x1xf32> to vector<1x4x256xf32>
    %33 = arith.mulf %0, %32 : vector<1x4x256xf32>
    %c0_15 = arith.constant 0 : index
    %c0_16 = arith.constant 0 : index
    %c0_17 = arith.constant 0 : index
    %34 = vector.load %arg6[%c0_15, %c0_16, %c0_17] : memref<1x4x256xf32, #tpu.memory_space<vmem>>, vector<1x4x256xf32>
    tpu.vector_store %arg6[%c0_15, %c0_16, %c0_17], %33 {strides = array<i32>} : memref<1x4x256xf32, #tpu.memory_space<vmem>>, vector<1x4x256xf32>,
    return
  }
  func.func @transform_0(%arg0: i32) -> (i32, i32, i32) {
    %c0_i32 = arith.constant 0 : i32
    %c0_i32_0 = arith.constant 0 : i32
    %c0_i32_1 = arith.constant 0 : i32
    return %arg0, %c0_i32, %c0_i32_0 : i32, i32, i32
  }
  func.func @transform_1(%arg0: i32) -> (i32, i32) {
    %c0_i32 = arith.constant 0 : i32
    %c0_i32_0 = arith.constant 0 : i32
    %c0_i32_1 = arith.constant 0 : i32
    return %c0_i32, %c0_i32_0 : i32, i32
  }
  func.func @transform_2(%arg0: i32) -> (i32, i32) {
    %c0_i32 = arith.constant 0 : i32
    %c0_i32_0 = arith.constant 0 : i32
    %c0_i32_1 = arith.constant 0 : i32
    return %c0_i32, %c0_i32_0 : i32, i32
  }
  func.func @transform_3(%arg0: i32) -> (i32, i32) {
    %c0_i32 = arith.constant 0 : i32
    %c0_i32_0 = arith.constant 0 : i32
    %c0_i32_1 = arith.constant 0 : i32
    return %c0_i32, %c0_i32_0 : i32, i32
  }
  func.func @transform_4(%arg0: i32) -> (i32, i32) {
    %c0_i32 = arith.constant 0 : i32
    %c0_i32_0 = arith.constant 0 : i32
    %c0_i32_1 = arith.constant 0 : i32
    return %c0_i32, %c0_i32_0 : i32, i32
  }
  func.func @transform_5(%arg0: i32) -> (i32, i32, i32) {
    %c0_i32 = arith.constant 0 : i32
    %c0_i32_0 = arith.constant 0 : i32
    %c0_i32_1 = arith.constant 0 : i32
    return %arg0, %c0_i32, %c0_i32_0 : i32, i32, i32
  }
}

</mosaic_0001>

<bundles_post_ra>
// kernel: tpu_custom_call.1
= control target key start
LH: loop header
LB: loop body
LE: loop exit
PB: predicated region body
PF: predicated region fallthrough
CT: control target
= control target key end

     0   :  { %10 = vsyncpa [#allocation3], 0  ;;  %s1092_s0 = inlined_call_operand.hbm [shape: f32[2,4,256], index: 0, kind: input, shape index: {}]   ;;  %s1093_s1 = inlined_call_operand.hbm [shape: f32[4,4], index: 1, kind: input, shape index: {}]   ;;  %s1094_s2 = inlined_call_operand.vmem [shape: f32[1,4], index: 2, kind: input, shape index: {}]   ;;  %s1095_s3 = inlined_call_operand.hbm [shape: f32[4,4], index: 3, kind: input, shape index: {}]   ;;  %s1096_s4 = inlined_call_operand.vmem [shape: f32[1,4], index: 4, kind: input, shape index: {}]   ;;  %s1097_s5 = inlined_call_operand.hbm [shape: f32[2,4,256], index: 5, kind: output, shape index: {}]  }
   0x1   :  { %12 = vsyncpa [#allocation3 + $0x1], 0 }
   0x2   :  { %13 = vsyncpa [#allocation6], 0 }
   0x3   :  { %14 = vsyncpa [#allocation4], 0 }
   0x4   :  { %16 = vsyncpa [#allocation4 + $0x1], 0  ;;  %s907_s18 = smov 0   ;;  %s909_s19 = smov 0  }
   0x5   :  { %s911_s20 = smov 0   ;;  %s913_s21 = smov 0  }
   0x6 LB: > { %s928_s22 = sadd.s32 4294967295, %s871_s21   ;;  %s600_s23 = sadd.s32 4294967294, %s871_s21   ;;  %s871_s21 = sphi %s913_s21, %s1107_s21   ;;  %s867_s20 = sphi %s911_s20, %s1106_s20   ;;  %s863_s19 = sphi %s909_s19, %s1105_s19   ;;  %s859_s18 = sphi %s907_s18, %s1104_s18  }
   0x7   : > { %p42_p0 = scmp.ne.s32.totalorder %s863_s19, %s859_s18  ;;  %p43_p1 = scmp.eq.s32.totalorder %s928_s22, 0 }
   0x8   : > { %p150_p2 = scmp.eq.s32.totalorder %s928_s22, 1  ;;  %p156_p3 = scmp.eq.s32.totalorder %s600_s23, 1 }
   0x9   : > { %p937_p4 = por %p43_p1, %p42_p0  ;;  %p601_p5 = scmp.ge.s32.totalorder %s871_s21, 1 }
   0xa   : > { %p942_p6 = por %p156_p3, %p42_p0  ;;  %p163_p7 = scmp.lt.s32.totalorder %s871_s21, 3 }
   0xb   : > { %s175_s28 = sshll.u32 %s1093_s1, 4  ;;  %s873_s30 = smov [#allocation5]   ;;  %s176_s28 = int_to_ptr.hbm [resolvable:$true] %s175_s28 }
   0xc   : > { %p950_p8 = pnand %p601_p5, %p163_p7  ;;  %s177_s6 = sshll.u32 %s873_s30, 4  ;;  %s178_s6 = int_to_ptr.vmem [resolvable:$true] %s177_s6 }
   0xd   : > { %s190_s9 = sshll.u32 %s1095_s3, 4  ;;  %s874_s10 = smov [#allocation7]   ;;  %s191_s9 = int_to_ptr.hbm [resolvable:$true] %s190_s9 }
   0xe   : > { %p634_p10 = pneg %p950_p8  ;;  %s192_s11 = sshll.u32 %s874_s10, 4  ;;  %s193_s11 = int_to_ptr.vmem [resolvable:$true] %s192_s11 }
   0xf   : > { %s963_s12 = sadd.s32 1, %s871_s21   ;;  %s29_s13 = sadd.s32 1, %s867_s20 }
  0x10   : > { %p635_p11 = pnand %p634_p10, %p43_p1  ;;  %s26_s14 = ssub.s32 %s871_s21, %s963_s12 }
  0x11   : > { %p36_p12 = scmp.ne.s32.totalorder %s867_s20, %s863_s19  ;;  %p27_p13 = scmp.eq.s32.totalorder %s26_s14, 0 }
  0x12   : > { %637 = dma.hbm_to_vmem [thread:$0]  (!%p635_p11), %s176_s28, 64, %s178_s6, [#allocation6]  }
  0x13   : > { %640 = dma.hbm_to_vmem [thread:$0]  (!%p635_p11), %s191_s9, 64, %s193_s11, [#allocation6]  }
  0x14   : > { %p37_p0 = scmp.eq.s32.totalorder %s871_s21, 0  ;;  %p973_p3 = por %p150_p2, %p36_p12 }
  0x15   : > { %p651_p5 = scmp.lt.s32.totalorder %s871_s21, 2  ;;  %s206_s17 = sand.u32 1, %s867_s20  }
  0x16   : > { %s979_s16 = scalar_select %p27_p13, %s867_s20, %s29_s13  }
  0x17   : > { %p38_p7 = por %p37_p0, %p36_p12  ;;  %s605_s23 = sshll.u32 %s206_s17, 3 }
  0x18   : > { %s620_s26 = sshll.u32 %s871_s21, 3  ;;  %s210_s6 = scalar_lea.vmem [#allocation2], %s605_s23 }
  0x19   : > { %s215_s30 = scalar_lea.hbm %s1092_s0, %s620_s26  ;;  %s219_s7 = sshll.u32 %s210_s6, 4  ;;  %s220_s7 = int_to_ptr.vmem [resolvable:$true] %s219_s7 }
  0x1a   : > { %s217_s8 = sshll.u32 %s215_s30, 4  ;;  %p986_p2 = pnand %p651_p5, %p38_p7  ;;  %s218_s8 = int_to_ptr.hbm [resolvable:$true] %s217_s8 }
  0x1b   : > { %s207_s10 = scalar_lea.sflag [#allocation3], %s206_s17  ;;  %s771_s11 = sshra.s32 %s218_s8, 4  ;;  %s772_s11 = int_to_ptr.hbm [resolvable:$true] %s771_s11 }
  0x1c   : > { %s773_s13 = scalar_lea.hbm %s772_s11, 8  ;;  %p775_p11 = pneg %p986_p2 }
  0x1d   : > { %p774_p10 = scmp.ne.s32.totalorder %s772_s11, %s773_s13  ;;  %s778_s26 = scalar_lea.hbm %s1092_s0, 16 }
  0x1e   : > { %p779_p0 = scmp.lt.s32.totalorder %s772_s11, %s1092_s0  ;;  %p780_p5 = scmp.lt.s32.totalorder %s778_s26, %s773_s13 }
  0x1f   : > { %p776_p12 = pnand %p775_p11, %p774_p10 }
  0x20   : > { %p781_p7 = por %p780_p5, %p779_p0 }
  0x21   : > { %p777_p13 = pneg %p776_p12 }
  0x23   : > { %p782_p9 = pnand %p781_p7, %p777_p13 }
  0x25   : > { %785 = shalt.err (!%p782_p9)
}
  0x26   : > { %644 = dma.hbm_to_vmem [thread:$0]  (!%p986_p2), %s218_s8, 128, %s220_s7, %s207_s10  }
  0x27   : > { %228 = sbr.rel (%p950_p8) target bundleno = 828 (0x33c), region = 40  ;;  %s1003_s17 = sand.u32 (!%p950_p8), 1, %s863_s19  }
  0x28   : > { %s609_s30 = sshll.u32 (!%p950_p8), %s1003_s17, 3  ;;  %s231_s6 = scalar_lea.sflag (!%p950_p8), [#allocation3], %s1003_s17 }
  0x29   : > { %s234_s11 = scalar_lea.vmem (!%p950_p8), [#allocation2], %s609_s30 }
  0x2c   : > { %846 = dma.done.wait (%p937_p4), %s231_s6, 128  }
  0x2d   : > { %848 = vsyncadd (%p937_p4), %s231_s6, 4294967168 }
  0x2e   : > { %850 = dma.done.wait (%p43_p1), [#allocation6], 128  }
  0x2f   : > { %852 = vsyncadd (%p43_p1), [#allocation6], 4294967168  ;;  %v289_v0 = vlaneseq  ;;  %v1022_v2 = vld [vmem:[%s234_s11] sm:$0xff]  ;;  %v286_v3 = vld [vmem:[#allocation5] sm:$0xf]  ;;  %vm279_vm0 = vcmask 1043456  }
  0x30   : > { %274 = vst [vmem:[#allocation1] ss:$2 sm:$0xff] %v1022_v2  ;;  %v295_v4 = vperm.slane %v286_v3, 1  ;;  %v309_v5 = vperm.slane %v286_v3, 3  ;;  %v302_v10 = vperm.slane %v286_v3, 2  ;;  %v288_v12 = vperm.slane %v286_v3, 0 }
  0x31   : > { %v1017_v1 = vshrl.u32 %v289_v0, 7  ;;  %v388_v13 = vld [vmem:[#allocation7] sm:$0xf]  ;;  %v875_v16 = vmov 0   ;;  %v701_v27 = vld [vmem:[%s1094_s2] ss:$0 sm:$0xff] }
  0x32   : > { %v397_v14 = vperm.slane %v388_v13, 1  ;;  %v411_v15 = vperm.slane %v388_v13, 3  ;;  %v390_v28 = vperm.slane %v388_v13, 0  ;;  %v404_v29 = vperm.slane %v388_v13, 2  ;;  %s621_s9 = sshll.u32 %s928_s22, 3  ;;  %s271_s23 = scalar_lea.vmem [#allocation8], %s609_s30 }
  0x33   : > { %692 = vset.pattern.permute.xlu1 %v1017_v1  ;;  %691 = vset.pattern.permute.xlu0 %v1017_v1  ;;  %v1033_v32 = vand.u32 127, %v289_v0  ;;  %vm346_vm1 = vcmask 1041409   ;;  %vm348_vm2 = vcmask 1042434   ;;  %vm350_vm3 = vcmask 1043459   ;;  %s506_s14 = scalar_lea.hbm %s1097_s5, %s621_s9  ;;  %s508_s26 = sshll.u32 %s271_s23, 4  ;;  %s509_s26 = int_to_ptr.vmem [resolvable:$true] %s508_s26 }
  0x34   : > { %693 = vset.pattern.permute.xlu2 %v1017_v1  ;;  %vm353_vm4 = vcmask 27648   ;;  %s510_s27 = sshll.u32 %s506_s14, 4  ;;  %s495_s28 = scalar_lea.sflag [#allocation4], %s1003_s17  ;;  %s511_s27 = int_to_ptr.hbm [resolvable:$true] %s510_s27 }
  0x35   : > { %s815_s6 = sshra.s32 %s511_s27, 4  ;;  %s821_s30 = scalar_lea.hbm %s1097_s5, 16  ;;  %s816_s6 = int_to_ptr.hbm [resolvable:$true] %s815_s6 }
  0x36   : > { %s817_s22 = scalar_lea.hbm %s816_s6, 8  ;;  %p822_p9 = scmp.lt.s32.totalorder %s816_s6, %s1097_s5 }
  0x37   : > { %v275_v6 = vld.sshfl [vmem:[#allocation1] sm:$0xff pattern:$0x75316420]  ;;  %v276_v7 = vld.sshfl [vmem:[#allocation1 + $0x8] sm:$0xff pattern:$0x75316420]  ;;  %p818_p1 = scmp.ne.s32.totalorder %s816_s6, %s817_s22  ;;  %p823_p2 = scmp.lt.s32.totalorder %s821_s30, %s817_s22 }
  0x38   : > { %v280_v8 = vsel %vm279_vm0, %v275_v6, 0.0  ;;  %v281_v9 = vsel %vm279_vm0, %v276_v7, 0.0  ;;  %v702_v6 = vld [vmem:[%s1096_s4] ss:$0 sm:$0xff] }
  0x39   : > { %v282_v11 = vadd.f32 %v281_v9, %v280_v8  ;;  %p819_p4 = pnand %p818_p1, %p973_p3  ;;  %p824_p10 = por %p823_p2, %p822_p9 }
  0x3b   : > { %300 = vperm.xlu1 %692, %v295_v4   ;;  %283 = vadd.xlane.f32.xlu0 %v282_v11  ;;  %p820_p8 = pneg %p819_p4 }
  0x3c   : > { %314 = vperm.xlu2 %693, %v309_v5  }
  0x3d   : > { %p825_p11 = pnand %p824_p10, %p820_p8 }
  0x43   : > { %307 = vperm.xlu1 %692, %v302_v10  }
  0x44   : > { %694 = vset.pattern.permute.xlu2 %v875_v16 }
  0x4b   : > { %695 = vset.pattern.permute.xlu1 %v875_v16 }
  0x4f   : > { %293 = vperm.xlu0 %691, %v288_v12  }
  0x57   : > { %402 = vperm.xlu0 %691, %v397_v14  }
  0x5f   : > { %416 = vperm.xlu0 %691, %v411_v15  }
  0x67   : > { %698 = vset.pattern.permute.xlu0 %v875_v16 }
  0x96   : > { %v315_v21 = vpop.permute.xlu2 %314 }
  0xad   : > { %v301_v19 = vpop.permute.xlu1 %300 }
  0xae   : > { %v284_v17 = vpop.xlane.xlu0 %283 }
  0xaf   : > { %v285_v18 = vmul.f32 0.00390625, %v284_v17 }
  0xb1   : > { %v321_v20 = vmul.f32 %v301_v19, %v285_v18  ;;  %v323_v22 = vmul.f32 %v315_v21, %v285_v18 }
  0xb3   : > { %332 = vperm.xlu1 %695, %v321_v20  }
  0xb5   : > { %v308_v25 = vpop.permute.xlu1 %307 }
  0xb6   : > { %v322_v26 = vmul.f32 %v308_v25, %v285_v18 }
  0xbb   : > { %338 = vperm.xlu1 %695, %v323_v22  }
  0xc1   : > { %v294_v23 = vpop.permute.xlu0 %293 }
  0xc2   : > { %v320_v24 = vmul.f32 %v294_v23, %v285_v18 }
  0xc3   : > { %696 = vset.pattern.permute.xlu1 %v1017_v1 }
  0xc4   : > { %329 = vperm.xlu2 %694, %v320_v24  }
  0xc9   : > { %v403_v51 = vpop.permute.xlu0 %402 }
  0xcb   : > { %364 = vperm.xlu1 %696, %v701_v27  }
  0xcc   : > { %335 = vperm.xlu2 %694, %v322_v26  }
  0xd1   : > { %v417_v62 = vpop.permute.xlu0 %416 }
  0xd3   : > { %395 = vperm.xlu1 %696, %v390_v28  }
  0xdb   : > { %409 = vperm.xlu1 %696, %v404_v29  }
  0xe3   : > { %697 = vset.pattern.permute.xlu1 %v875_v16 }
 0x11e   : > { %v330_v30 = vpop.permute.xlu2 %329 }
 0x11f   : > { %v342_v35 = vperm.slane %v330_v30, %v1033_v32 }
 0x125   : > { %v333_v31 = vpop.permute.xlu1 %332 }
 0x126   : > { %v343_v33 = vperm.slane %v333_v31, %v1033_v32  ;;  %v336_v34 = vpop.permute.xlu2 %335 }
 0x127   : > { %v344_v36 = vperm.slane %v336_v34, %v1033_v32  ;;  %v876_v34 = vmov 839922192  }
 0x128   : > { %v347_v37 = vsel %vm346_vm1, %v343_v33, %v342_v35  ;;  %v488_v35 = vunpack.c.l.s4 %v876_v34 }
 0x129   : > { %v349_v40 = vsel %vm348_vm2, %v344_v36, %v347_v37 }
 0x12a   : > { %v489_v36 = vunpack.c.0.s8 %v488_v35 }
 0x12d   : > { %v339_v38 = vpop.permute.xlu1 %338 }
 0x12e   : > { %v345_v39 = vperm.slane %v339_v38, %v1033_v32 }
 0x130   : > { %v351_v41 = vsel %vm350_vm3, %v345_v39, %v349_v40 }
 0x131   : > { %v354_v42 = vsel %vm353_vm4, %v351_v41, 0.0 }
 0x132   : > { %355 = vadd.xlane.f32.xlu2 %v354_v42 }
 0x13d   : > { %v365_v43 = vpop.permute.xlu1 %364 }
 0x145   : > { %v396_v59 = vpop.permute.xlu1 %395 }
 0x14d   : > { %v410_v4 = vpop.permute.xlu1 %409 }
 0x1a5   : > { %v356_v44 = vpop.xlane.xlu2 %355 }
 0x1a6   : > { %v367_v45 = vadd.f32 %v365_v43, %v356_v44 }
 0x1a8   : > { %v613_v46 = vmul.f32 -1.442695, %v367_v45 }
 0x1aa   : > { %703 = vpow2.f32 %v613_v46 }
 0x1b0   : > { %v704_v47 = vpop.eup %703 }
 0x1b1   : > { %v371_v48 = vadd.f32 1.0, %v704_v47 }
 0x1b3   : > { %705 = vrcp.f32 %v371_v48  ;;  %v383_v53 = vand.u32 2147483648, %v371_v48  ;;  %v381_v55 = vand.u32 2147483647, %v371_v48  ;;  %vm377_vm6 = vweird.f32 %v371_v48 }
 0x1b5   : > { %v384_v57 = vor.u32 1.1754944e-38, %v383_v53  ;;  %vm382_vm8 = vcmp.eq.f32.partialorder %v381_v55, 8.507059e+37 }
 0x1b9   : > { %v706_v49 = vpop.eup %705 }
 0x1ba   : > { %v373_v50 = vmul.f32 %v706_v49, %v371_v48  ;;  %vm378_vm5 = vweird.f32 %v706_v49 }
 0x1bb   : > { %vm379_vm7 = vmor %vm377_vm6, %vm378_vm5 }
 0x1bc   : > { %v374_v52 = vsub.f32 1.0, %v373_v50 }
 0x1be   : > { %v375_v54 = vmul.f32 %v706_v49, %v374_v52 }
 0x1c0   : > { %v376_v56 = vadd.f32 %v706_v49, %v375_v54 }
 0x1c2   : > { %v380_v58 = vsel %vm379_vm7, %v706_v49, %v376_v56 }
 0x1c3   : > { %v385_v60 = vsel %vm382_vm8, %v384_v57, %v380_v58 }
 0x1c4   : > { %v387_v61 = vmul.f32 %v385_v60, %v367_v45 }
 0x1c6   : > { %v422_v63 = vmul.f32 %v396_v59, %v387_v61  ;;  %v423_v0 = vmul.f32 %v403_v51, %v387_v61  ;;  %v425_v3 = vmul.f32 %v417_v62, %v387_v61  ;;  %v424_v5 = vmul.f32 %v410_v4, %v387_v61 }
 0x1c8   : > { %431 = vperm.xlu1 %697, %v422_v63   ;;  %434 = vperm.xlu0 %698, %v423_v0  }
 0x1c9   : > { %440 = vperm.xlu2 %694, %v425_v3  }
 0x1d0   : > { %437 = vperm.xlu1 %697, %v424_v5   ;;  %699 = vset.pattern.permute.xlu0 %v1017_v1 }
 0x1d8   : > { %460 = vperm.xlu0 %699, %v702_v6  }
 0x1e0   : > { %700 = vset.pattern.permute.xlu0 %v875_v16 }
 0x223   : > { %v441_v11 = vpop.permute.xlu2 %440 }
 0x224   : > { %v445_v14 = vperm.slane %v441_v11, %v1033_v32 }
 0x23a   : > { %v432_v7 = vpop.permute.xlu1 %431  ;;  %v435_v8 = vpop.permute.xlu0 %434 }
 0x23b   : > { %v442_v9 = vperm.slane %v432_v7, %v1033_v32  ;;  %v443_v10 = vperm.slane %v435_v8, %v1033_v32 }
 0x23d   : > { %v446_v1 = vsel %vm346_vm1, %v443_v10, %v442_v9 }
 0x242   : > { %v438_v12 = vpop.permute.xlu1 %437 }
 0x243   : > { %v444_v13 = vperm.slane %v438_v12, %v1033_v32 }
 0x245   : > { %v447_v15 = vsel %vm348_vm2, %v444_v13, %v446_v1 }
 0x246   : > { %v448_v17 = vsel %vm350_vm3, %v445_v14, %v447_v15 }
 0x247   : > { %v450_v16 = vsel %vm353_vm4, %v448_v17, 0.0 }
 0x248   : > { %451 = vadd.xlane.f32.xlu1 %v450_v16 }
 0x24a   : > { %v461_v18 = vpop.permute.xlu0 %460 }
 0x2bb   : > { %v452_v19 = vpop.xlane.xlu1 %451 }
 0x2bc   : > { %v463_v20 = vadd.f32 %v461_v18, %v452_v19 }
 0x2be   : > { %v614_v21 = vmul.f32 -1.442695, %v463_v20 }
 0x2c0   : > { %707 = vpow2.f32 %v614_v21 }
 0x2c6   : > { %v708_v22 = vpop.eup %707 }
 0x2c7   : > { %v467_v23 = vadd.f32 1.0, %v708_v22 }
 0x2c9   : > { %709 = vrcp.f32 %v467_v23  ;;  %v479_v27 = vand.u32 2147483648, %v467_v23  ;;  %v477_v29 = vand.u32 2147483647, %v467_v23  ;;  %vm473_vm10 = vweird.f32 %v467_v23 }
 0x2cb   : > { %v480_v31 = vor.u32 1.1754944e-38, %v479_v27  ;;  %vm478_vm12 = vcmp.eq.f32.partialorder %v477_v29, 8.507059e+37 }
 0x2cf   : > { %v710_v24 = vpop.eup %709 }
 0x2d0   : > { %v469_v25 = vmul.f32 %v710_v24, %v467_v23  ;;  %vm474_vm9 = vweird.f32 %v710_v24 }
 0x2d1   : > { %vm475_vm11 = vmor %vm473_vm10, %vm474_vm9 }
 0x2d2   : > { %v470_v26 = vsub.f32 1.0, %v469_v25 }
 0x2d4   : > { %v471_v28 = vmul.f32 %v710_v24, %v470_v26 }
 0x2d6   : > { %v472_v30 = vadd.f32 %v710_v24, %v471_v28 }
 0x2d8   : > { %v476_v32 = vsel %vm475_vm11, %v710_v24, %v472_v30 }
 0x2d9   : > { %v481_v33 = vsel %vm478_vm12, %v480_v31, %v476_v32 }
 0x2da   : > { %485 = vperm.xlu2 %694, %v481_v33  }
 0x334   : > { %v486_v37 = vpop.permute.xlu2 %485 }
 0x335   : > { %v490_v38 = vperm.slane %v486_v37, %v489_v36 }
 0x337   : > { %v492_v39 = vmul.f32 %v490_v38, %v1022_v2 }
 0x339   : > { %493 = vst [vmem:[%s271_s23] sm:$0xff] %v492_v39 }
 0x33a   : > { %828 = shalt.err (!%p825_p11)
}
 0x33b   : > { %632 = dma.vmem_to_hbm [thread:$0]  (%p973_p3), %s509_s26, 128, %s511_s27, %s495_s28  }
 0x33c PF: > { %s522_s17 = sand.u32 1, %s859_s18   ;;  %p1103_p12 = scmp.ge.s32.totalorder %s871_s21, 2 }
 0x33d   : > { %s523_s8 = scalar_lea.sflag [#allocation4], %s522_s17 }
 0x33e   : > { %p646_p13 = pnand %p1103_p12, %p942_p6 }
 0x340   : > { %p647_p0 = pneg %p646_p13 }
 0x342   : > { %854 = dma.done.wait (%p647_p0), %s523_s8, 128  }
 0x343   : > { %856 = vsyncadd (%p647_p0), %s523_s8, 4294967168  ;;  %p19_p5 = scmp.ge.s32.totalorder %s963_s12, 4   ;;  %s1104_s18 = smov %s863_s19 }
 0x344   : > { %s1105_s19 = smov %s867_s20  ;;  %s1106_s20 = smov %s979_s16 }
 0x345   : > { %s1107_s21 = smov %s963_s12  ;;  %21 = sbr.rel (!%p19_p5) target bundleno = 6 (0x6), region = 93 }
 0x34a   :  { %529 = vsyncpa [#allocation3], 1 }
 0x34b   :  { %531 = vsyncpa [#allocation3 + $0x1], 1 }
 0x34c   :  { %532 = vsyncpa [#allocation6], 1 }
 0x34d   :  { %533 = vsyncpa [#allocation4], 1 }
 0x34e   :  { %535 = vsyncpa [#allocation4 + $0x1], 1 }

// kernel: tpu_custom_call.1
= control target key start
LH: loop header
LB: loop body
LE: loop exit
PB: predicated region body
PF: predicated region fallthrough
CT: control target
= control target key end

     0   :  { %10 = vsyncpa [#allocation3], 0  ;;  %s1092_s0 = inlined_call_operand.hbm [shape: f32[2,4,256], index: 0, kind: input, shape index: {}]   ;;  %s1093_s1 = inlined_call_operand.hbm [shape: f32[4,4], index: 1, kind: input, shape index: {}]   ;;  %s1094_s2 = inlined_call_operand.vmem [shape: f32[1,4], index: 2, kind: input, shape index: {}]   ;;  %s1095_s3 = inlined_call_operand.hbm [shape: f32[4,4], index: 3, kind: input, shape index: {}]   ;;  %s1096_s4 = inlined_call_operand.vmem [shape: f32[1,4], index: 4, kind: input, shape index: {}]   ;;  %s1097_s5 = inlined_call_operand.hbm [shape: f32[2,4,256], index: 5, kind: output, shape index: {}]  }
   0x1   :  { %12 = vsyncpa [#allocation3 + $0x1], 0 }
   0x2   :  { %13 = vsyncpa [#allocation6], 0 }
   0x3   :  { %14 = vsyncpa [#allocation4], 0 }
   0x4   :  { %16 = vsyncpa [#allocation4 + $0x1], 0  ;;  %s907_s18 = smov 0   ;;  %s909_s19 = smov 0  }
   0x5   :  { %s911_s20 = smov 0   ;;  %s913_s21 = smov 0  }
   0x6 LB: > { %s928_s22 = sadd.s32 4294967295, %s871_s21   ;;  %s600_s23 = sadd.s32 4294967294, %s871_s21   ;;  %s871_s21 = sphi %s913_s21, %s1107_s21   ;;  %s867_s20 = sphi %s911_s20, %s1106_s20   ;;  %s863_s19 = sphi %s909_s19, %s1105_s19   ;;  %s859_s18 = sphi %s907_s18, %s1104_s18  }
   0x7   : > { %p42_p0 = scmp.ne.s32.totalorder %s863_s19, %s859_s18  ;;  %p43_p1 = scmp.eq.s32.totalorder %s928_s22, 0 }
   0x8   : > { %p150_p2 = scmp.eq.s32.totalorder %s928_s22, 1  ;;  %p156_p3 = scmp.eq.s32.totalorder %s600_s23, 1 }
   0x9   : > { %p937_p4 = por %p43_p1, %p42_p0  ;;  %p601_p5 = scmp.ge.s32.totalorder %s871_s21, 1 }
   0xa   : > { %p942_p6 = por %p156_p3, %p42_p0  ;;  %p163_p7 = scmp.lt.s32.totalorder %s871_s21, 3 }
   0xb   : > { %s175_s28 = sshll.u32 %s1093_s1, 4  ;;  %s873_s30 = smov [#allocation5]   ;;  %s176_s28 = int_to_ptr.hbm [resolvable:$true] %s175_s28 }
   0xc   : > { %p950_p8 = pnand %p601_p5, %p163_p7  ;;  %s177_s6 = sshll.u32 %s873_s30, 4  ;;  %s178_s6 = int_to_ptr.vmem [resolvable:$true] %s177_s6 }
   0xd   : > { %s190_s9 = sshll.u32 %s1095_s3, 4  ;;  %s874_s10 = smov [#allocation7]   ;;  %s191_s9 = int_to_ptr.hbm [resolvable:$true] %s190_s9 }
   0xe   : > { %p634_p10 = pneg %p950_p8  ;;  %s192_s11 = sshll.u32 %s874_s10, 4  ;;  %s193_s11 = int_to_ptr.vmem [resolvable:$true] %s192_s11 }
   0xf   : > { %s963_s12 = sadd.s32 1, %s871_s21   ;;  %s29_s13 = sadd.s32 1, %s867_s20 }
  0x10   : > { %p635_p11 = pnand %p634_p10, %p43_p1  ;;  %s26_s14 = ssub.s32 %s871_s21, %s963_s12 }
  0x11   : > { %p36_p12 = scmp.ne.s32.totalorder %s867_s20, %s863_s19  ;;  %p27_p13 = scmp.eq.s32.totalorder %s26_s14, 0 }
  0x12   : > { %637 = dma.hbm_to_vmem [thread:$0]  (!%p635_p11), %s176_s28, 64, %s178_s6, [#allocation6]  }
  0x13   : > { %640 = dma.hbm_to_vmem [thread:$0]  (!%p635_p11), %s191_s9, 64, %s193_s11, [#allocation6]  }
  0x14   : > { %p37_p0 = scmp.eq.s32.totalorder %s871_s21, 0  ;;  %p973_p3 = por %p150_p2, %p36_p12 }
  0x15   : > { %p651_p5 = scmp.lt.s32.totalorder %s871_s21, 2  ;;  %s206_s17 = sand.u32 1, %s867_s20  }
  0x16   : > { %s979_s16 = scalar_select %p27_p13, %s867_s20, %s29_s13  }
  0x17   : > { %p38_p7 = por %p37_p0, %p36_p12  ;;  %s605_s23 = sshll.u32 %s206_s17, 3 }
  0x18   : > { %s620_s26 = sshll.u32 %s871_s21, 3  ;;  %s210_s6 = scalar_lea.vmem [#allocation2], %s605_s23 }
  0x19   : > { %s215_s30 = scalar_lea.hbm %s1092_s0, %s620_s26  ;;  %s219_s7 = sshll.u32 %s210_s6, 4  ;;  %s220_s7 = int_to_ptr.vmem [resolvable:$true] %s219_s7 }
  0x1a   : > { %s217_s8 = sshll.u32 %s215_s30, 4  ;;  %p986_p2 = pnand %p651_p5, %p38_p7  ;;  %s218_s8 = int_to_ptr.hbm [resolvable:$true] %s217_s8 }
  0x1b   : > { %s207_s10 = scalar_lea.sflag [#allocation3], %s206_s17  ;;  %s771_s11 = sshra.s32 %s218_s8, 4  ;;  %s772_s11 = int_to_ptr.hbm [resolvable:$true] %s771_s11 }
  0x1c   : > { %s773_s13 = scalar_lea.hbm %s772_s11, 8  ;;  %p775_p11 = pneg %p986_p2 }
  0x1d   : > { %p774_p10 = scmp.ne.s32.totalorder %s772_s11, %s773_s13  ;;  %s778_s26 = scalar_lea.hbm %s1092_s0, 16 }
  0x1e   : > { %p779_p0 = scmp.lt.s32.totalorder %s772_s11, %s1092_s0  ;;  %p780_p5 = scmp.lt.s32.totalorder %s778_s26, %s773_s13 }
  0x1f   : > { %p776_p12 = pnand %p775_p11, %p774_p10 }
  0x20   : > { %p781_p7 = por %p780_p5, %p779_p0 }
  0x21   : > { %p777_p13 = pneg %p776_p12 }
  0x23   : > { %p782_p9 = pnand %p781_p7, %p777_p13 }
  0x25   : > { %785 = shalt.err (!%p782_p9)
}
  0x26   : > { %644 = dma.hbm_to_vmem [thread:$0]  (!%p986_p2), %s218_s8, 128, %s220_s7, %s207_s10  }
  0x27   : > { %228 = sbr.rel (%p950_p8) target bundleno = 828 (0x33c), region = 40  ;;  %s1003_s17 = sand.u32 (!%p950_p8), 1, %s863_s19  }
  0x28   : > { %s609_s30 = sshll.u32 (!%p950_p8), %s1003_s17, 3  ;;  %s231_s6 = scalar_lea.sflag (!%p950_p8), [#allocation3], %s1003_s17 }
  0x29   : > { %s234_s11 = scalar_lea.vmem (!%p950_p8), [#allocation2], %s609_s30 }
  0x2c   : > { %846 = dma.done.wait (%p937_p4), %s231_s6, 128  }
  0x2d   : > { %848 = vsyncadd (%p937_p4), %s231_s6, 4294967168 }
  0x2e   : > { %850 = dma.done.wait (%p43_p1), [#allocation6], 128  }
  0x2f   : > { %852 = vsyncadd (%p43_p1), [#allocation6], 4294967168  ;;  %v289_v0 = vlaneseq  ;;  %v1022_v2 = vld [vmem:[%s234_s11] sm:$0xff]  ;;  %v286_v3 = vld [vmem:[#allocation5] sm:$0xf]  ;;  %vm279_vm0 = vcmask 1043456  }
  0x30   : > { %274 = vst [vmem:[#allocation1] ss:$2 sm:$0xff] %v1022_v2  ;;  %v295_v4 = vperm.slane %v286_v3, 1  ;;  %v309_v5 = vperm.slane %v286_v3, 3  ;;  %v302_v10 = vperm.slane %v286_v3, 2  ;;  %v288_v12 = vperm.slane %v286_v3, 0 }
  0x31   : > { %v1017_v1 = vshrl.u32 %v289_v0, 7  ;;  %v388_v13 = vld [vmem:[#allocation7] sm:$0xf]  ;;  %v875_v16 = vmov 0   ;;  %v701_v27 = vld [vmem:[%s1094_s2] ss:$0 sm:$0xff] }
  0x32   : > { %v397_v14 = vperm.slane %v388_v13, 1  ;;  %v411_v15 = vperm.slane %v388_v13, 3  ;;  %v390_v28 = vperm.slane %v388_v13, 0  ;;  %v404_v29 = vperm.slane %v388_v13, 2  ;;  %s621_s9 = sshll.u32 %s928_s22, 3  ;;  %s271_s23 = scalar_lea.vmem [#allocation8], %s609_s30 }
  0x33   : > { %692 = vset.pattern.permute.xlu1 %v1017_v1  ;;  %691 = vset.pattern.permute.xlu0 %v1017_v1  ;;  %v1033_v32 = vand.u32 127, %v289_v0  ;;  %vm346_vm1 = vcmask 1041409   ;;  %vm348_vm2 = vcmask 1042434   ;;  %vm350_vm3 = vcmask 1043459   ;;  %s506_s14 = scalar_lea.hbm %s1097_s5, %s621_s9  ;;  %s508_s26 = sshll.u32 %s271_s23, 4  ;;  %s509_s26 = int_to_ptr.vmem [resolvable:$true] %s508_s26 }
  0x34   : > { %693 = vset.pattern.permute.xlu2 %v1017_v1  ;;  %vm353_vm4 = vcmask 27648   ;;  %s510_s27 = sshll.u32 %s506_s14, 4  ;;  %s495_s28 = scalar_lea.sflag [#allocation4], %s1003_s17  ;;  %s511_s27 = int_to_ptr.hbm [resolvable:$true] %s510_s27 }
  0x35   : > { %s815_s6 = sshra.s32 %s511_s27, 4  ;;  %s821_s30 = scalar_lea.hbm %s1097_s5, 16  ;;  %s816_s6 = int_to_ptr.hbm [resolvable:$true] %s815_s6 }
  0x36   : > { %s817_s22 = scalar_lea.hbm %s816_s6, 8  ;;  %p822_p9 = scmp.lt.s32.totalorder %s816_s6, %s1097_s5 }
  0x37   : > { %v275_v6 = vld.sshfl [vmem:[#allocation1] sm:$0xff pattern:$0x75316420]  ;;  %v276_v7 = vld.sshfl [vmem:[#allocation1 + $0x8] sm:$0xff pattern:$0x75316420]  ;;  %p818_p1 = scmp.ne.s32.totalorder %s816_s6, %s817_s22  ;;  %p823_p2 = scmp.lt.s32.totalorder %s821_s30, %s817_s22 }
  0x38   : > { %v280_v8 = vsel %vm279_vm0, %v275_v6, 0.0  ;;  %v281_v9 = vsel %vm279_vm0, %v276_v7, 0.0  ;;  %v702_v6 = vld [vmem:[%s1096_s4] ss:$0 sm:$0xff] }
  0x39   : > { %v282_v11 = vadd.f32 %v281_v9, %v280_v8  ;;  %p819_p4 = pnand %p818_p1, %p973_p3  ;;  %p824_p10 = por %p823_p2, %p822_p9 }
  0x3b   : > { %300 = vperm.xlu1 %692, %v295_v4   ;;  %283 = vadd.xlane.f32.xlu0 %v282_v11  ;;  %p820_p8 = pneg %p819_p4 }
  0x3c   : > { %314 = vperm.xlu2 %693, %v309_v5  }
  0x3d   : > { %p825_p11 = pnand %p824_p10, %p820_p8 }
  0x43   : > { %307 = vperm.xlu1 %692, %v302_v10  }
  0x44   : > { %694 = vset.pattern.permute.xlu2 %v875_v16 }
  0x4b   : > { %695 = vset.pattern.permute.xlu1 %v875_v16 }
  0x4f   : > { %293 = vperm.xlu0 %691, %v288_v12  }
  0x57   : > { %402 = vperm.xlu0 %691, %v397_v14  }
  0x5f   : > { %416 = vperm.xlu0 %691, %v411_v15  }
  0x67   : > { %698 = vset.pattern.permute.xlu0 %v875_v16 }
  0x96   : > { %v315_v21 = vpop.permute.xlu2 %314 }
  0xad   : > { %v301_v19 = vpop.permute.xlu1 %300 }
  0xae   : > { %v284_v17 = vpop.xlane.xlu0 %283 }
  0xaf   : > { %v285_v18 = vmul.f32 0.00390625, %v284_v17 }
  0xb1   : > { %v321_v20 = vmul.f32 %v301_v19, %v285_v18  ;;  %v323_v22 = vmul.f32 %v315_v21, %v285_v18 }
  0xb3   : > { %332 = vperm.xlu1 %695, %v321_v20  }
  0xb5   : > { %v308_v25 = vpop.permute.xlu1 %307 }
  0xb6   : > { %v322_v26 = vmul.f32 %v308_v25, %v285_v18 }
  0xbb   : > { %338 = vperm.xlu1 %695, %v323_v22  }
  0xc1   : > { %v294_v23 = vpop.permute.xlu0 %293 }
  0xc2   : > { %v320_v24 = vmul.f32 %v294_v23, %v285_v18 }
  0xc3   : > { %696 = vset.pattern.permute.xlu1 %v1017_v1 }
  0xc4   : > { %329 = vperm.xlu2 %694, %v320_v24  }
  0xc9   : > { %v403_v51 = vpop.permute.xlu0 %402 }
  0xcb   : > { %364 = vperm.xlu1 %696, %v701_v27  }
  0xcc   : > { %335 = vperm.xlu2 %694, %v322_v26  }
  0xd1   : > { %v417_v62 = vpop.permute.xlu0 %416 }
  0xd3   : > { %395 = vperm.xlu1 %696, %v390_v28  }
  0xdb   : > { %409 = vperm.xlu1 %696, %v404_v29  }
  0xe3   : > { %697 = vset.pattern.permute.xlu1 %v875_v16 }
 0x11e   : > { %v330_v30 = vpop.permute.xlu2 %329 }
 0x11f   : > { %v342_v35 = vperm.slane %v330_v30, %v1033_v32 }
 0x125   : > { %v333_v31 = vpop.permute.xlu1 %332 }
 0x126   : > { %v343_v33 = vperm.slane %v333_v31, %v1033_v32  ;;  %v336_v34 = vpop.permute.xlu2 %335 }
 0x127   : > { %v344_v36 = vperm.slane %v336_v34, %v1033_v32  ;;  %v876_v34 = vmov 839922192  }
 0x128   : > { %v347_v37 = vsel %vm346_vm1, %v343_v33, %v342_v35  ;;  %v488_v35 = vunpack.c.l.s4 %v876_v34 }
 0x129   : > { %v349_v40 = vsel %vm348_vm2, %v344_v36, %v347_v37 }
 0x12a   : > { %v489_v36 = vunpack.c.0.s8 %v488_v35 }
 0x12d   : > { %v339_v38 = vpop.permute.xlu1 %338 }
 0x12e   : > { %v345_v39 = vperm.slane %v339_v38, %v1033_v32 }
 0x130   : > { %v351_v41 = vsel %vm350_vm3, %v345_v39, %v349_v40 }
 0x131   : > { %v354_v42 = vsel %vm353_vm4, %v351_v41, 0.0 }
 0x132   : > { %355 = vadd.xlane.f32.xlu2 %v354_v42 }
 0x13d   : > { %v365_v43 = vpop.permute.xlu1 %364 }
 0x145   : > { %v396_v59 = vpop.permute.xlu1 %395 }
 0x14d   : > { %v410_v4 = vpop.permute.xlu1 %409 }
 0x1a5   : > { %v356_v44 = vpop.xlane.xlu2 %355 }
 0x1a6   : > { %v367_v45 = vadd.f32 %v365_v43, %v356_v44 }
 0x1a8   : > { %v613_v46 = vmul.f32 -1.442695, %v367_v45 }
 0x1aa   : > { %703 = vpow2.f32 %v613_v46 }
 0x1b0   : > { %v704_v47 = vpop.eup %703 }
 0x1b1   : > { %v371_v48 = vadd.f32 1.0, %v704_v47 }
 0x1b3   : > { %705 = vrcp.f32 %v371_v48  ;;  %v383_v53 = vand.u32 2147483648, %v371_v48  ;;  %v381_v55 = vand.u32 2147483647, %v371_v48  ;;  %vm377_vm6 = vweird.f32 %v371_v48 }
 0x1b5   : > { %v384_v57 = vor.u32 1.1754944e-38, %v383_v53  ;;  %vm382_vm8 = vcmp.eq.f32.partialorder %v381_v55, 8.507059e+37 }
 0x1b9   : > { %v706_v49 = vpop.eup %705 }
 0x1ba   : > { %v373_v50 = vmul.f32 %v706_v49, %v371_v48  ;;  %vm378_vm5 = vweird.f32 %v706_v49 }
 0x1bb   : > { %vm379_vm7 = vmor %vm377_vm6, %vm378_vm5 }
 0x1bc   : > { %v374_v52 = vsub.f32 1.0, %v373_v50 }
 0x1be   : > { %v375_v54 = vmul.f32 %v706_v49, %v374_v52 }
 0x1c0   : > { %v376_v56 = vadd.f32 %v706_v49, %v375_v54 }
 0x1c2   : > { %v380_v58 = vsel %vm379_vm7, %v706_v49, %v376_v56 }
 0x1c3   : > { %v385_v60 = vsel %vm382_vm8, %v384_v57, %v380_v58 }
 0x1c4   : > { %v387_v61 = vmul.f32 %v385_v60, %v367_v45 }
 0x1c6   : > { %v422_v63 = vmul.f32 %v396_v59, %v387_v61  ;;  %v423_v0 = vmul.f32 %v403_v51, %v387_v61  ;;  %v425_v3 = vmul.f32 %v417_v62, %v387_v61  ;;  %v424_v5 = vmul.f32 %v410_v4, %v387_v61 }
 0x1c8   : > { %431 = vperm.xlu1 %697, %v422_v63   ;;  %434 = vperm.xlu0 %698, %v423_v0  }
 0x1c9   : > { %440 = vperm.xlu2 %694, %v425_v3  }
 0x1d0   : > { %437 = vperm.xlu1 %697, %v424_v5   ;;  %699 = vset.pattern.permute.xlu0 %v1017_v1 }
 0x1d8   : > { %460 = vperm.xlu0 %699, %v702_v6  }
 0x1e0   : > { %700 = vset.pattern.permute.xlu0 %v875_v16 }
 0x223   : > { %v441_v11 = vpop.permute.xlu2 %440 }
 0x224   : > { %v445_v14 = vperm.slane %v441_v11, %v1033_v32 }
 0x23a   : > { %v432_v7 = vpop.permute.xlu1 %431  ;;  %v435_v8 = vpop.permute.xlu0 %434 }
 0x23b   : > { %v442_v9 = vperm.slane %v432_v7, %v1033_v32  ;;  %v443_v10 = vperm.slane %v435_v8, %v1033_v32 }
 0x23d   : > { %v446_v1 = vsel %vm346_vm1, %v443_v10, %v442_v9 }
 0x242   : > { %v438_v12 = vpop.permute.xlu1 %437 }
 0x243   : > { %v444_v13 = vperm.slane %v438_v12, %v1033_v32 }
 0x245   : > { %v447_v15 = vsel %vm348_vm2, %v444_v13, %v446_v1 }
 0x246   : > { %v448_v17 = vsel %vm350_vm3, %v445_v14, %v447_v15 }
 0x247   : > { %v450_v16 = vsel %vm353_vm4, %v448_v17, 0.0 }
 0x248   : > { %451 = vadd.xlane.f32.xlu1 %v450_v16 }
 0x24a   : > { %v461_v18 = vpop.permute.xlu0 %460 }
 0x2bb   : > { %v452_v19 = vpop.xlane.xlu1 %451 }
 0x2bc   : > { %v463_v20 = vadd.f32 %v461_v18, %v452_v19 }
 0x2be   : > { %v614_v21 = vmul.f32 -1.442695, %v463_v20 }
 0x2c0   : > { %707 = vpow2.f32 %v614_v21 }
 0x2c6   : > { %v708_v22 = vpop.eup %707 }
 0x2c7   : > { %v467_v23 = vadd.f32 1.0, %v708_v22 }
 0x2c9   : > { %709 = vrcp.f32 %v467_v23  ;;  %v479_v27 = vand.u32 2147483648, %v467_v23  ;;  %v477_v29 = vand.u32 2147483647, %v467_v23  ;;  %vm473_vm10 = vweird.f32 %v467_v23 }
 0x2cb   : > { %v480_v31 = vor.u32 1.1754944e-38, %v479_v27  ;;  %vm478_vm12 = vcmp.eq.f32.partialorder %v477_v29, 8.507059e+37 }
 0x2cf   : > { %v710_v24 = vpop.eup %709 }
 0x2d0   : > { %v469_v25 = vmul.f32 %v710_v24, %v467_v23  ;;  %vm474_vm9 = vweird.f32 %v710_v24 }
 0x2d1   : > { %vm475_vm11 = vmor %vm473_vm10, %vm474_vm9 }
 0x2d2   : > { %v470_v26 = vsub.f32 1.0, %v469_v25 }
 0x2d4   : > { %v471_v28 = vmul.f32 %v710_v24, %v470_v26 }
 0x2d6   : > { %v472_v30 = vadd.f32 %v710_v24, %v471_v28 }
 0x2d8   : > { %v476_v32 = vsel %vm475_vm11, %v710_v24, %v472_v30 }
 0x2d9   : > { %v481_v33 = vsel %vm478_vm12, %v480_v31, %v476_v32 }
 0x2da   : > { %485 = vperm.xlu2 %694, %v481_v33  }
 0x334   : > { %v486_v37 = vpop.permute.xlu2 %485 }
 0x335   : > { %v490_v38 = vperm.slane %v486_v37, %v489_v36 }
 0x337   : > { %v492_v39 = vmul.f32 %v490_v38, %v1022_v2 }
 0x339   : > { %493 = vst [vmem:[%s271_s23] sm:$0xff] %v492_v39 }
 0x33a   : > { %828 = shalt.err (!%p825_p11)
}
 0x33b   : > { %632 = dma.vmem_to_hbm [thread:$0]  (%p973_p3), %s509_s26, 128, %s511_s27, %s495_s28  }
 0x33c PF: > { %s522_s17 = sand.u32 1, %s859_s18   ;;  %p1103_p12 = scmp.ge.s32.totalorder %s871_s21, 2 }
 0x33d   : > { %s523_s8 = scalar_lea.sflag [#allocation4], %s522_s17 }
 0x33e   : > { %p646_p13 = pnand %p1103_p12, %p942_p6 }
 0x340   : > { %p647_p0 = pneg %p646_p13 }
 0x342   : > { %854 = dma.done.wait (%p647_p0), %s523_s8, 128  }
 0x343   : > { %856 = vsyncadd (%p647_p0), %s523_s8, 4294967168  ;;  %p19_p5 = scmp.ge.s32.totalorder %s963_s12, 4   ;;  %s1104_s18 = smov %s863_s19 }
 0x344   : > { %s1105_s19 = smov %s867_s20  ;;  %s1106_s20 = smov %s979_s16 }
 0x345   : > { %s1107_s21 = smov %s963_s12  ;;  %21 = sbr.rel (!%p19_p5) target bundleno = 6 (0x6), region = 93 }
 0x34a   :  { %529 = vsyncpa [#allocation3], 1 }
 0x34b   :  { %531 = vsyncpa [#allocation3 + $0x1], 1 }
 0x34c   :  { %532 = vsyncpa [#allocation6], 1 }
 0x34d   :  { %533 = vsyncpa [#allocation4], 1 }
 0x34e   :  { %535 = vsyncpa [#allocation4 + $0x1], 1 }

</bundles_post_ra>
